<compile_context>
chip_gen: v6e
topology: v6e:2x2x1
jax: 0.10.0
libtpu: 0.0.40
codegen_flags: <defaults>
</compile_context>

<pallas_src>
import jax
import jax.numpy as jnp
from jax.experimental import pallas as pl
from jax.experimental.pallas import tpu as pltpu

_EPS = 1e-12


# --------------------------------------------------------------------------
# Kernel
# --------------------------------------------------------------------------
def _make_kernel(reduce_axis, compute_dtype):
    """relu + L1-normalize over `reduce_axis` of the VMEM block."""

    def kernel(x_ref, o_ref):
        # relu + broadcast multiply in compute_dtype (bf16-native on v6e/v7x),
        # accumulation / clamp / reciprocal always in f32.
        x = jnp.maximum(x_ref[...].astype(compute_dtype), 0)
        s = jnp.sum(x, axis=reduce_axis, keepdims=True, dtype=jnp.float32)
        s = jnp.maximum(s, _EPS)                       # F.normalize eps clamp
        inv = pl.reciprocal(s, approx=True)            # EUP slot (otherwise idle)
        inv = inv * (2.0 - s * inv)                    # 1 Newton step -> ~f32 precision
        o_ref[...] = (x * inv.astype(compute_dtype)).astype(o_ref.dtype)

    return kernel


# --------------------------------------------------------------------------
# Hardware / tiling heuristics
# --------------------------------------------------------------------------
def _vmem_capacity_bytes():
    try:
        return int(pltpu.get_tpu_info().vmem_capacity_bytes)
    except Exception:
        return 64 << 20  # conservative fallback (v7x per-TC VMEM)


def _is_v5e():
    try:
        kind = jax.devices()[0].device_kind.lower()
    except Exception:
        return False
    return ("v5 lite" in kind) or ("v5e" in kind) or ("v5lite" in kind)


def _compute_dtype(in_dtype):
    dt = jnp.dtype(in_dtype)
    if dt in (jnp.dtype(jnp.bfloat16), jnp.dtype(jnp.float16)) and not _is_v5e():
        return dt              # bf16/f16-native VALU path (v6e / v7x)
    return jnp.dtype(jnp.float32)


def _sublane_multiple(dtype):
    # Native tiles: (8,128) f32 / (16,128) bf16,f16 / (32,128) int8,fp8.
    itemsize = jnp.dtype(dtype).itemsize
    return max(8, 32 // max(itemsize, 1))


def _target_block_bytes():
    # 2x in dbuf + 2x out dbuf + ~2x compute-dtype temporaries  =>  keep one
    # block near VMEM/12 so total stays comfortably under the scoped limit.
    return max(1 << 20, _vmem_capacity_bytes() // 12)


def _pick_row_tile(rows, feat, dtype, target_block_bytes, min_steps):
    """Lane-reduce path (dim == last): block = (row_tile, feat)."""
    sub = _sublane_multiple(dtype)
    bytes_per_row = max(feat * jnp.dtype(dtype).itemsize, 1)
    # Uncapped byte-target tile (perf review: no max_row_tile clamp).
    tile = (target_block_bytes // bytes_per_row) // sub * sub
    tile = max(sub, tile)
    # Keep >= min_steps grid steps when the data allows it (megacore sharding).
    steps_cap = -(-rows // min_steps)                     # ceil(rows / min_steps)
    steps_cap = max(sub, -(-steps_cap // sub) * sub)      # round up to sublane multiple
    tile = min(tile, steps_cap)
    # Don't tile far past the data.
    rows_rounded = -(-rows // sub) * sub
    return max(sub, min(tile, rows_rounded))


def _pick_sublane_tiles(B, N, L, dtype, target_block_bytes, min_steps):
    """Sublane-reduce path (dim != last): block = (bt, N, lt)."""
    itemsize = jnp.dtype(dtype).itemsize
    bytes_per_lane_col = max(N * itemsize, 1)
    if (target_block_bytes // bytes_per_lane_col) >= L or L <= 128:
        lt = L                                            # full lane extent
    else:
        lt = max(128, (target_block_bytes // bytes_per_lane_col) // 128 * 128)
    lane_steps = -(-L // lt)
    block_bytes_per_b = max(N * lt * itemsize, 1)
    bt = max(1, target_block_bytes // block_bytes_per_b)
    # Ensure the (parallel) grid has >= min_steps steps when possible.
    needed_b_steps = max(1, -(-min_steps // lane_steps))
    bt = min(bt, max(1, -(-B // needed_b_steps)))
    bt = min(bt, B)
    return bt, lt
    # TODO(synk): if N * 128 * itemsize alone exceeds the VMEM budget, a
    # two-pass feat-tiled variant (running L1 sum scratch) would be needed.


# --------------------------------------------------------------------------
# Wrapper
# --------------------------------------------------------------------------
def positive_norm(t, dim=-1, *, row_tile=None, target_block_bytes=None,
                  min_grid_steps=4):
    """relu + L1-normalize along `dim`, computed in a Pallas TPU kernel."""
    ndim = t.ndim
    axis = dim % ndim
    dtype = t.dtype
    itemsize = jnp.dtype(dtype).itemsize
    compute_dtype = _compute_dtype(dtype)
    if target_block_bytes is None:
        target_block_bytes = _target_block_bytes()
    vmem_limit = (_vmem_capacity_bytes() * 3) // 4

    total = int(t.size)
    norm_len = int(t.shape[axis])
    cost = pl.CostEstimate(
        flops=2 * total,                               # relu + broadcast multiply
        transcendentals=total // max(norm_len, 1),     # one reciprocal per vector
        bytes_accessed=2 * total * itemsize,           # stream in + stream out
    )

    if axis == ndim - 1:
        # ---------------- lane-reduce path (normalize along lanes) ----------
        feat = t.shape[-1]
        rows = total // max(feat, 1)
        x2d = t.reshape(rows, feat)
        if row_tile is None:
            row_tile = _pick_row_tile(rows, feat, dtype, target_block_bytes,
                                      min_grid_steps)
        out2d = pl.pallas_call(
            _make_kernel(-1, compute_dtype),
            out_shape=jax.ShapeDtypeStruct((rows, feat), dtype),
            grid=(pl.cdiv(rows, row_tile),),
            in_specs=[pl.BlockSpec((row_tile, feat), lambda i: (i, 0))],
            out_specs=pl.BlockSpec((row_tile, feat), lambda i: (i, 0)),
            compiler_params=pltpu.CompilerParams(
                dimension_semantics=("parallel",),
                vmem_limit_bytes=vmem_limit,
            ),
            cost_estimate=cost,
        )(x2d)
        return out2d.reshape(t.shape)

    # ------------- sublane-reduce path (dim != last, transpose-free) --------
    B = 1
    for d in t.shape[:axis]:
        B *= int(d)
    N = norm_len
    L = 1
    for d in t.shape[axis + 1:]:
        L *= int(d)
    x3d = t.reshape(B, N, L)                     # free reshape, no data movement
    bt, lt = _pick_sublane_tiles(B, N, L, dtype, target_block_bytes,
                                 min_grid_steps)
    out3d = pl.pallas_call(
        _make_kernel(-2, compute_dtype),
        out_shape=jax.ShapeDtypeStruct((B, N, L), dtype),
        grid=(pl.cdiv(B, bt), pl.cdiv(L, lt)),
        in_specs=[pl.BlockSpec((bt, N, lt), lambda b, l: (b, 0, l))],
        out_specs=pl.BlockSpec((bt, N, lt), lambda b, l: (b, 0, l)),
        compiler_params=pltpu.CompilerParams(
            dimension_semantics=("parallel", "parallel"),
            vmem_limit_bytes=vmem_limit,
        ),
        cost_estimate=cost,
    )(x3d)
    return out3d.reshape(t.shape)


def positive_norm_ref(t, dim=-1):
    """Pure-JAX reference (mirrors F.normalize(F.relu(t), dim=dim, p=1))."""
    x = jnp.maximum(t, 0.0)
    s = jnp.sum(x, axis=dim, keepdims=True)
    return x / jnp.maximum(s, 1e-12)


# --------------------------------------------------------------------------
# Demo / self-test
# --------------------------------------------------------------------------
if __name__ == "__main__":
    key = jax.random.PRNGKey(0)
    k1, k2, k3, k4, k5 = jax.random.split(key, 5)

    # (batch, seq, hidden) -- normalize along hidden (dim=-1).
    x = jax.random.normal(k1, (2, 8, 32), dtype=jnp.float32)
    out = jax.block_until_ready(positive_norm(x))
    assert out.shape == x.shape
    assert jnp.allclose(out, positive_norm_ref(x), atol=1e-5, rtol=1e-5), \
        "f32 mismatch vs reference"

    # Ragged row count (rows=76, not a multiple of row_tile), multiple grid steps.
    y = jax.random.normal(k2, (4, 19, 32), dtype=jnp.float32)
    out_y = jax.block_until_ready(positive_norm(y, row_tile=8))
    assert jnp.allclose(out_y, positive_norm_ref(y), atol=1e-5, rtol=1e-5), \
        "ragged mismatch"

    # bf16 input: dtype-native compute (f32 accumulation), bf16 output.
    z = jax.random.normal(k3, (2, 8, 32), dtype=jnp.bfloat16)
    out_z = jax.block_until_ready(positive_norm(z))
    ref_z = positive_norm_ref(z.astype(jnp.float32)).astype(jnp.bfloat16)
    assert jnp.allclose(out_z.astype(jnp.float32), ref_z.astype(jnp.float32),
                        atol=1e-2, rtol=1e-2), "bf16 mismatch vs reference"

    # dim != -1: transpose-free sublane-reduce path (normalize over channels).
    w = jax.random.normal(k4, (2, 4, 16, 16), dtype=jnp.float32)
    out_w = jax.block_until_ready(positive_norm(w, dim=1))
    assert jnp.allclose(out_w, positive_norm_ref(w, dim=1),
                        atol=1e-5, rtol=1e-5), "dim=1 mismatch vs reference"

    # Tall-skinny input: exercises the uncapped row tile + min-steps grid cap.
    v = jax.random.normal(k5, (2048, 32), dtype=jnp.float32)
    out_v = jax.block_until_ready(positive_norm(v))
    assert jnp.allclose(out_v, positive_norm_ref(v), atol=1e-5, rtol=1e-5), \
        "tall-skinny mismatch vs reference"

    print("KERNEL_OK")
</pallas_src>

<mosaic_0001>
module attributes {stable_mosaic.version = 11 : i64} {
  func.func @kernel(%arg0: i32, %arg1: memref<8x32xf32, #tpu.memory_space<vmem>>, %arg2: memref<8x32xf32, #tpu.memory_space<vmem>>) attributes {dimension_semantics = [#tpu.dimension_semantics<parallel>], iteration_bounds = array<i64: 2>, scalar_prefetch = 0 : i64, scratch_operands = 0 : i64, tpu.core_type = #tpu.core_type<tc>, window_params = [{transform_indices = @transform_0, window_bounds = array<i64: 8, 32>}, {transform_indices = @transform_1, window_bounds = array<i64: 8, 32>}]} {
    %c0 = arith.constant 0 : index
    %c0_0 = arith.constant 0 : index
    %0 = vector.load %arg1[%c0, %c0_0] : memref<8x32xf32, #tpu.memory_space<vmem>>, vector<8x32xf32>
    %cst = arith.constant 0.000000e+00 : f32
    %1 = vector.broadcast %cst : f32 to vector<8x32xf32>
    %2 = arith.maximumf %0, %1 : vector<8x32xf32>
    %cst_1 = arith.constant dense<0.000000e+00> : vector<8xf32>
    %3 = vector.multi_reduction <add>, %2, %cst_1 [1] : vector<8x32xf32> to vector<8xf32>
    %4 = vector.shape_cast %3 : vector<8xf32> to vector<8x1xf32>
    %cst_2 = arith.constant 9.99999996E-13 : f32
    %5 = vector.broadcast %cst_2 : f32 to vector<8x1xf32>
    %6 = arith.maximumf %4, %5 : vector<8x1xf32>
    %7 = tpu.reciprocal %6 {approx = true} : vector<8x1xf32> -> vector<8x1xf32>
    %8 = arith.mulf %6, %7 : vector<8x1xf32>
    %cst_3 = arith.constant 2.000000e+00 : f32
    %9 = vector.broadcast %cst_3 : f32 to vector<8x1xf32>
    %10 = arith.subf %9, %8 : vector<8x1xf32>
    %11 = arith.mulf %7, %10 : vector<8x1xf32>
    %12 = vector.broadcast %11 : vector<8x1xf32> to vector<8x32xf32>
    %13 = arith.mulf %2, %12 : vector<8x32xf32>
    %c0_4 = arith.constant 0 : index
    %c0_5 = arith.constant 0 : index
    %14 = vector.load %arg2[%c0_4, %c0_5] : memref<8x32xf32, #tpu.memory_space<vmem>>, vector<8x32xf32>
    tpu.vector_store %arg2[%c0_4, %c0_5], %13 {strides = array<i32>} : memref<8x32xf32, #tpu.memory_space<vmem>>, vector<8x32xf32>,
    return
  }
  func.func @transform_0(%arg0: i32) -> (i32, i32) {
    %c0_i32 = arith.constant 0 : i32
    %c0_i32_0 = arith.constant 0 : i32
    return %arg0, %c0_i32 : i32, i32
  }
  func.func @transform_1(%arg0: i32) -> (i32, i32) {
    %c0_i32 = arith.constant 0 : i32
    %c0_i32_0 = arith.constant 0 : i32
    return %arg0, %c0_i32 : i32, i32
  }
}

</mosaic_0001>

<bundles_post_ra>
// kernel: tpu_custom_call.1
= control target key start
LH: loop header
LB: loop body
LE: loop exit
PB: predicated region body
PF: predicated region fallthrough
CT: control target
= control target key end

     0   :  { %6 = vsyncpa [#allocation3], 0  ;;  %s538_s0 = inlined_call_operand.hbm [shape: f32[16,32], index: 0, kind: input, shape index: {}]   ;;  %s539_s1 = inlined_call_operand.hbm [shape: f32[16,32], index: 1, kind: output, shape index: {}]  }
   0x1   :  { %8 = vsyncpa [#allocation3 + $0x1], 0 }
   0x2   :  { %9 = vsyncpa [#allocation4], 0 }
   0x3   :  { %11 = vsyncpa [#allocation4 + $0x1], 0  ;;  %s395_s6 = smov 0   ;;  %s397_s7 = smov 0  }
   0x4   :  { %s399_s8 = smov 0   ;;  %s401_s9 = smov 0  }
   0x5 LB: > { %s416_s10 = sadd.s32 4294967295, %s381_s9   ;;  %s229_s11 = sadd.s32 4294967294, %s381_s9   ;;  %s381_s9 = sphi %s401_s9, %s556_s9   ;;  %s377_s8 = sphi %s399_s8, %s555_s8   ;;  %s373_s7 = sphi %s397_s7, %s554_s7   ;;  %s369_s6 = sphi %s395_s6, %s553_s6  }
   0x6   : > { %s420_s12 = sadd.s32 1, %s381_s9   ;;  %s24_s13 = sadd.s32 1, %s377_s8 }
   0x7   : > { %s21_s14 = ssub.s32 %s381_s9, %s420_s12  ;;  %p31_p0 = scmp.ne.s32.totalorder %s377_s8, %s373_s7 }
   0x8   : > { %p22_p1 = scmp.eq.s32.totalorder %s21_s14, 0  ;;  %p32_p2 = scmp.eq.s32.totalorder %s381_s9, 0 }
   0x9   : > { %p37_p3 = scmp.ne.s32.totalorder %s373_s7, %s369_s6  ;;  %p38_p4 = scmp.eq.s32.totalorder %s416_s10, 0 }
   0xa   : > { %s432_s15 = scalar_select %p22_p1, %s377_s8, %s24_s13  }
   0xb   : > { %p434_p5 = por %p32_p2, %p31_p0  ;;  %p438_p6 = por %p38_p4, %p37_p3 }
   0xc   : > { %p61_p7 = scmp.eq.s32.totalorder %s416_s10, 1  ;;  %p67_p8 = scmp.eq.s32.totalorder %s229_s11, 1 }
   0xd   : > { %s543_s17 = scalar_select %p438_p6, 1, 0 }
   0xe   : > { %p253_p10 = scmp.lt.s32.totalorder %s381_s9, 2  ;;  %p445_p11 = por %p61_p7, %p31_p0 }
   0xf   : > { %p449_p12 = por %p67_p8, %p37_p3  ;;  %s87_s20 = sand.u32 1, %s377_s8  }
  0x10   : > { %s544_s18 = scalar_select %p445_p11, 1, 0 }
  0x11   : > { %s545_s19 = scalar_select %p449_p12, 1, 0 }
  0x12   : > { %s233_s21 = sshll.u32 %s381_s9, 7  ;;  %s232_s22 = sshll.u32 %s87_s20, 3 }
  0x13   : > { %s458_s25 = scalar_lea.hbm %s538_s0, %s233_s21  ;;  %s91_s26 = scalar_lea.vmem [#allocation2], %s232_s22 }
  0x14   : > { %s98_s27 = sshll.u32 %s91_s26, 4  ;;  %p462_p13 = pnand %p253_p10, %p434_p5  ;;  %s466_s27 = int_to_ptr.vmem [resolvable:$true] %s98_s27 }
  0x15   : > { %s88_s29 = scalar_lea.sflag [#allocation3], %s87_s20  ;;  %s289_s30 = scalar_lea.hbm %s458_s25, 128 }
  0x16   : > { %p290_p2 = scmp.ne.s32.totalorder %s458_s25, %s289_s30  ;;  %p291_p3 = pneg %p462_p13 }
  0x17   : > { %s294_s4 = scalar_lea.hbm %s538_s0, 256  ;;  %p295_p5 = scmp.lt.s32.totalorder %s458_s25, %s538_s0 }
  0x18   : > { %p292_p4 = pnand %p291_p3, %p290_p2  ;;  %p296_p8 = scmp.lt.s32.totalorder %s294_s4, %s289_s30 }
  0x1a   : > { %p293_p7 = pneg %p292_p4  ;;  %p297_p10 = por %p296_p8, %p295_p5 }
  0x1c   : > { %p298_p9 = pnand %p297_p10, %p293_p7 }
  0x1e   : > { %301 = shalt.err (!%p298_p9)
}
  0x1f   : > { %s302_s13 = scalar_lea.vmem %s466_s27, 128  ;;  %s383_s14 = smov [#allocation2]  }
  0x20   : > { %p303_p0 = scmp.ne.s32.totalorder %s466_s27, %s302_s13  ;;  %s307_s16 = sshll.u32 %s383_s14, 4  ;;  %s308_s16 = int_to_ptr.vmem [resolvable:$false] %s307_s16 }
  0x21   : > { %s309_s20 = scalar_lea.vmem %s308_s16, 256  ;;  %p310_p4 = scmp.lt.s32.totalorder %s466_s27, %s308_s16 }
  0x22   : > { %p305_p1 = pnand %p303_p0, %p291_p3  ;;  %p311_p12 = scmp.lt.s32.totalorder %s309_s20, %s302_s13 }
  0x24   : > { %p306_p2 = pneg %p305_p1  ;;  %p312_p11 = por %p311_p12, %p310_p4 }
  0x26   : > { %p313_p6 = pnand %p312_p11, %p306_p2 }
  0x28   : > { %316 = shalt.err (!%p313_p6)
}
  0x29   : > { %248 = dma.hbm_to_vmem [thread:$0]  (!%p462_p13), %s458_s25, 128, %s466_s27, %s88_s29  }
  0x2a   : > { %p547_p9 = scmp.lt.s32.totalorder %s381_s9, 3  ;;  %p548_p7 = scmp.ge.s32.totalorder %s381_s9, 1 }
  0x2c   : > { %p104_p0 = pnand %p548_p7, %p547_p9 }
  0x2d   : > { %s493_s21 = sand.u32 (!%p104_p0), 1, %s373_s7   ;;  %p549_p6 = scmp.ne.s32.totalorder (!%p104_p0), %s543_s17, 0 }
  0x2e   : > { %107 = sbr.rel (%p104_p0) target bundleno = 231 (0xe7), region = 24  ;;  %s235_s22 = sshll.u32 (!%p104_p0), %s493_s21, 3 }
  0x2f   : > { %s110_s23 = scalar_lea.sflag (!%p104_p0), [#allocation3], %s493_s21  ;;  %s113_s24 = scalar_lea.vmem (!%p104_p0), [#allocation2], %s235_s22 }
  0x33   : > { %360 = dma.done.wait (%p549_p6), %s110_s23, 128  }
  0x34   : > { %362 = vsyncadd (%p549_p6), %s110_s23, 4294967168  ;;  %v132_v0 = vld [vmem:[%s113_s24] sm:$0xff]  ;;  %vm134_vm0 = vcmask 261120   ;;  %s238_s25 = sshll.u32 %s416_s10, 7  ;;  %s131_s26 = scalar_lea.vmem [#allocation5], %s235_s22 }
  0x35   : > { %v133_v1 = vmax.f32 %v132_v0, 0.0  ;;  %s159_s27 = sshll.u32 %s131_s26, 4  ;;  %s157_s29 = scalar_lea.hbm %s539_s1, %s238_s25  ;;  %s160_s27 = int_to_ptr.vmem [resolvable:$true] %s159_s27 }
  0x36   : > { %s146_s30 = scalar_lea.sflag [#allocation4], %s493_s21  ;;  %s317_s2 = scalar_lea.vmem %s160_s27, 128 }
  0x37   : > { %v135_v2 = vsel %vm134_vm0, %v133_v1, 0.0  ;;  %p318_p11 = scmp.ne.s32.totalorder %s160_s27, %s317_s2  ;;  %p550_p12 = scmp.ne.s32.totalorder %s544_s18, 0 }
  0x38   : > { %136 = vadd.xlane.f32.xlu0 %v135_v2  ;;  %s384_s3 = smov [#allocation5]  }
  0x39   : > { %p319_p13 = pnand %p318_p11, %p550_p12  ;;  %s321_s4 = sshll.u32 %s384_s3, 4  ;;  %s322_s4 = int_to_ptr.vmem [resolvable:$false] %s321_s4 }
  0x3a   : > { %s323_s10 = scalar_lea.vmem %s322_s4, 256  ;;  %p324_p3 = scmp.lt.s32.totalorder %s160_s27, %s322_s4 }
  0x3b   : > { %p320_p1 = pneg %p319_p13  ;;  %p325_p5 = scmp.lt.s32.totalorder %s323_s10, %s317_s2 }
  0x3d   : > { %p326_p8 = por %p325_p5, %p324_p3 }
  0x3f   : > { %p327_p10 = pnand %p326_p8, %p320_p1 }
  0xc1   : > { %v137_v3 = vpop.xlane.xlu0 %136 }
  0xc2   : > { %v138_v4 = vmax.f32 %v137_v3, 1e-12 }
  0xc4   : > { %287 = vrcp.f32 %v138_v4 }
  0xd1   : > { %v288_v5 = vpop.eup %287 }
  0xd2   : > { %v140_v6 = vmul.f32 %v288_v5, %v138_v4 }
  0xd4   : > { %v141_v7 = vsub.f32 2.0, %v140_v6 }
  0xd6   : > { %v142_v8 = vmul.f32 %v288_v5, %v141_v7 }
  0xd8   : > { %v143_v9 = vmul.f32 %v142_v8, %v133_v1 }
  0xda   : > { %144 = vst.msk [vmem:[%s131_s26] sm:$0xff] %vm134_vm0, %v143_v9 }
  0xdb   : > { %330 = shalt.err (!%p327_p10)
}
  0xdc   : > { %s331_s5 = scalar_lea.hbm %s157_s29, 128  ;;  %s335_s14 = scalar_lea.hbm %s539_s1, 256 }
  0xdd   : > { %p332_p2 = scmp.ne.s32.totalorder %s157_s29, %s331_s5  ;;  %p336_p7 = scmp.lt.s32.totalorder %s157_s29, %s539_s1 }
  0xde   : > { %p337_p0 = scmp.lt.s32.totalorder %s335_s14, %s331_s5 }
  0xdf   : > { %p333_p4 = pnand %p332_p2, %p550_p12 }
  0xe0   : > { %p338_p6 = por %p337_p0, %p336_p7 }
  0xe1   : > { %p334_p9 = pneg %p333_p4 }
  0xe3   : > { %p339_p11 = pnand %p338_p6, %p334_p9 }
  0xe5   : > { %342 = shalt.err (!%p339_p11)
}
  0xe6   : > { %243 = dma.vmem_to_hbm [thread:$0]  (%p550_p12), %s160_s27, 128, %s157_s29, %s146_s30  }
  0xe7 PF: > { %s171_s21 = sand.u32 1, %s369_s6   ;;  %p551_p13 = scmp.ne.s32.totalorder %s545_s19, 0 }
  0xe8   : > { %p552_p1 = scmp.ge.s32.totalorder %s381_s9, 2  ;;  %s172_s22 = scalar_lea.sflag [#allocation4], %s171_s21 }
  0xea   : > { %p250_p3 = pnand %p552_p1, %p551_p13 }
  0xec   : > { %p251_p5 = pneg %p250_p3 }
  0xee   : > { %364 = dma.done.wait (%p251_p5), %s172_s22, 128  }
  0xef   : > { %366 = vsyncadd (%p251_p5), %s172_s22, 4294967168  ;;  %p14_p8 = scmp.ge.s32.totalorder %s420_s12, 4   ;;  %s553_s6 = smov %s373_s7 }
  0xf0   : > { %s554_s7 = smov %s377_s8  ;;  %s555_s8 = smov %s432_s15 }
  0xf1   : > { %s556_s9 = smov %s420_s12  ;;  %16 = sbr.rel (!%p14_p8) target bundleno = 5 (0x5), region = 69 }
  0xf6   :  { %177 = vsyncpa [#allocation3], 1 }
  0xf7   :  { %179 = vsyncpa [#allocation3 + $0x1], 1 }
  0xf8   :  { %180 = vsyncpa [#allocation4], 1 }
  0xf9   :  { %182 = vsyncpa [#allocation4 + $0x1], 1 }

</bundles_post_ra>
